<compile_context>
chip_gen: v6e
topology: v6e:2x2x1
jax: 0.10.0
libtpu: 0.0.40
codegen_flags: <defaults>
</compile_context>

<pallas_src>
import functools

import jax
import jax.numpy as jnp
from jax.experimental import pallas as pl
from jax.experimental.pallas import tpu as pltpu

_LANE = 128


def _round_up(x, m):
    return ((x + m - 1) // m) * m


def _pad2(x, rows, cols):
    r, c = x.shape
    return jnp.pad(x, ((0, rows - r), (0, cols - c)))


def _sage_layer_kernel(a_ref, h_ref, w_ref, b_ref, o_ref, acc_ref, *, activation):
    """One SAGEConv('gcn') layer tile:  o = activation(A_hat @ h @ W + b).

    Grid = (row_tiles, k_tiles).  The K (neighbor/reduction) axis is last and
    'arbitrary'; the output block index is constant along K, so the output /
    accumulator stays resident across the reduction (init/finalize via pl.when).
    """
    k = pl.program_id(1)

    @pl.when(k == 0)
    def _init():
        acc_ref[...] = jnp.zeros_like(acc_ref)

    # Dominant O(N^2 * F) aggregation: bf16 MXU inputs, f32 accumulation.
    acc_ref[...] += jnp.dot(
        a_ref[...],                              # bf16 A_hat tile  [tm, tk]
        h_ref[...].astype(jnp.bfloat16),         # bf16 feature tile [tk, f_in]
        preferred_element_type=jnp.float32,
    )

    @pl.when(k == pl.num_programs(1) - 1)
    def _finalize():
        # Small O(N * F_in * F_out) transform; f32 for accuracy (cost ~ nil).
        z = jnp.dot(acc_ref[...], w_ref[...],
                    preferred_element_type=jnp.float32) + b_ref[...]
        o_ref[...] = activation(z)


def _sage_layer(a_bf16, h, w, b, activation, *, tm, tk, transcendental=False):
    """activation(A_hat @ h @ W + b) for padded, lane-dense operands."""
    n_pad = a_bf16.shape[0]
    f_in = h.shape[1]
    f_out = w.shape[1]
    grid = (n_pad // tm, n_pad // tk)

    flops = 2 * n_pad * n_pad * f_in + 2 * n_pad * f_in * f_out
    transcendentals = n_pad * f_out if transcendental else 0
    bytes_accessed = (2 * n_pad * n_pad            # bf16 A_hat
                      + 4 * n_pad * f_in           # f32 features
                      + 4 * n_pad * f_out          # f32 output
                      + 4 * (f_in * f_out + f_out))

    kernel = functools.partial(_sage_layer_kernel, activation=activation)

    return pl.pallas_call(
        kernel,
        out_shape=jax.ShapeDtypeStruct((n_pad, f_out), jnp.float32),
        grid_spec=pltpu.PrefetchScalarGridSpec(
            num_scalar_prefetch=0,
            grid=grid,
            in_specs=[
                pl.BlockSpec((tm, tk), lambda i, k: (i, k)),       # A_hat tile
                pl.BlockSpec((tk, f_in), lambda i, k: (k, 0)),     # feature tile
                pl.BlockSpec((f_in, f_out), lambda i, k: (0, 0)),  # W (VMEM resident)
                pl.BlockSpec((1, f_out), lambda i, k: (0, 0)),     # bias
            ],
            out_specs=pl.BlockSpec((tm, f_out), lambda i, k: (i, 0)),
            scratch_shapes=[pltpu.VMEM((tm, f_in), jnp.float32)],
        ),
        compiler_params=pltpu.CompilerParams(
            dimension_semantics=("parallel", "arbitrary"),
            vmem_limit_bytes=32 * 1024 * 1024,
        ),
        cost_estimate=pl.CostEstimate(
            flops=flops,
            transcendentals=transcendentals,
            bytes_accessed=bytes_accessed,
        ),
    )(a_bf16, h, w, b)


def sage_forward(a_hat, x, w1, b1, w2, b2, w3, b3):
    """3-layer SAGE (gcn aggregation) forward:  relu, relu, sigmoid."""
    n, in_feats = x.shape
    hid = w1.shape[1]
    out_feats = w3.shape[1]

    # Tile sizes: lane dim must be a multiple of 128; bigger tiles approach the
    # HBM roofline once N is non-toy.
    tile = 512 if n >= 2048 else 128
    tm = tk = tile
    n_pad = _round_up(n, tile)

    f_in = _round_up(in_feats, _LANE)
    f_hid = _round_up(hid, _LANE)
    f_out = _round_up(out_feats, _LANE)

    # Zero-pad to lane-dense shapes.  Exact: padded nodes have zero adjacency
    # columns (never contaminate real nodes) and padded features/units carry
    # zero weights/bias, so they contribute nothing downstream.
    a_p = _pad2(a_hat.astype(jnp.float32), n_pad, n_pad).astype(jnp.bfloat16)
    x_p = _pad2(x.astype(jnp.float32), n_pad, f_in)
    w1_p = _pad2(w1, f_in, f_hid)
    b1_p = _pad2(b1, 1, f_hid)
    w2_p = _pad2(w2, f_hid, f_hid)
    b2_p = _pad2(b2, 1, f_hid)
    w3_p = _pad2(w3, f_hid, f_out)
    b3_p = _pad2(b3, 1, f_out)

    relu = lambda v: jnp.maximum(v, 0.0)

    h = _sage_layer(a_p, x_p, w1_p, b1_p, relu, tm=tm, tk=tk)
    h = _sage_layer(a_p, h, w2_p, b2_p, relu, tm=tm, tk=tk)
    h = _sage_layer(a_p, h, w3_p, b3_p, jax.nn.sigmoid, tm=tm, tk=tk,
                    transcendental=True)

    return h[:n, :out_feats]


def sage_reference(a_hat, x, w1, b1, w2, b2, w3, b3):
    h = jnp.maximum(a_hat @ x @ w1 + b1, 0.0)
    h = jnp.maximum(a_hat @ h @ w2 + b2, 0.0)
    return jax.nn.sigmoid(a_hat @ h @ w3 + b3)


def _make_inputs(key, n, in_feats, hid, out_feats, p_edge=0.3):
    ks = jax.random.split(key, 8)
    # Symmetric adjacency without self loops, like dgl.graph((u,v)) both ways.
    upper = (jax.random.uniform(ks[0], (n, n)) < p_edge).astype(jnp.float32)
    upper = jnp.triu(upper, k=1)
    adj = upper + upper.T                                   # A[i, j] = edge j -> i
    in_deg = jnp.sum(adj, axis=1)
    a_hat = (adj + jnp.eye(n, dtype=jnp.float32)) / (in_deg[:, None] + 1.0)

    x = jax.random.uniform(ks[1], (n, in_feats), dtype=jnp.float32)
    w1 = jax.random.normal(ks[2], (in_feats, hid), dtype=jnp.float32) * 0.1
    b1 = jax.random.normal(ks[3], (1, hid), dtype=jnp.float32) * 0.1
    w2 = jax.random.normal(ks[4], (hid, hid), dtype=jnp.float32) * 0.1
    b2 = jax.random.normal(ks[5], (1, hid), dtype=jnp.float32) * 0.1
    w3 = jax.random.normal(ks[6], (hid, out_feats), dtype=jnp.float32) * 0.1
    b3 = jax.random.normal(ks[7], (1, out_feats), dtype=jnp.float32) * 0.1
    return a_hat, x, w1, b1, w2, b2, w3, b3


if __name__ == "__main__":
    IN_FEATS, HID_FEATS, OUT_FEATS = 8, 32, 4
    key = jax.random.PRNGKey(0)
    k_small, k_big = jax.random.split(key)

    # Karate-club-sized graph (34 nodes), matching the original script.
    args = _make_inputs(k_small, 34, IN_FEATS, HID_FEATS, OUT_FEATS)
    out = jax.block_until_ready(sage_forward(*args))
    ref = sage_reference(*args)
    assert out.shape == (34, OUT_FEATS)
    assert jnp.allclose(out, ref, atol=3e-2, rtol=3e-2), \
        float(jnp.max(jnp.abs(out - ref)))

    # Larger graph to exercise the (row, K) grid and the accumulator path.
    args = _make_inputs(k_big, 300, IN_FEATS, HID_FEATS, OUT_FEATS)
    out = jax.block_until_ready(sage_forward(*args))
    ref = sage_reference(*args)
    assert out.shape == (300, OUT_FEATS)
    assert jnp.allclose(out, ref, atol=3e-2, rtol=3e-2), \
        float(jnp.max(jnp.abs(out - ref)))

    print("KERNEL_OK")
</pallas_src>

<mosaic_0001>
module attributes {stable_mosaic.version = 11 : i64} {
  func.func @_sage_layer_kernel(%arg0: i32, %arg1: i32, %arg2: memref<128x128xbf16, #tpu.memory_space<vmem>>, %arg3: memref<128x128xf32, #tpu.memory_space<vmem>>, %arg4: memref<128x128xf32, #tpu.memory_space<vmem>>, %arg5: memref<1x128xf32, #tpu.memory_space<vmem>>, %arg6: memref<128x128xf32, #tpu.memory_space<vmem>>, %arg7: memref<128x128xf32, #tpu.memory_space<vmem>>) attributes {dimension_semantics = [#tpu.dimension_semantics<parallel>, #tpu.dimension_semantics<arbitrary>], iteration_bounds = array<i64: 1, 1>, scalar_prefetch = 0 : i64, scratch_operands = 1 : i64, tpu.core_type = #tpu.core_type<tc>, window_params = [{transform_indices = @transform_0, window_bounds = array<i64: 128, 128>}, {transform_indices = @transform_1, window_bounds = array<i64: 128, 128>}, {pipeline_mode = #tpu.pipeline_mode<synchronous>, transform_indices = @transform_2, window_bounds = array<i64: 128, 128>}, {pipeline_mode = #tpu.pipeline_mode<synchronous>, transform_indices = @transform_3, window_bounds = array<i64: 1, 128>}, {transform_indices = @transform_4, window_bounds = array<i64: 128, 128>}]} {
    %c0_i32 = arith.constant 0 : i32
    %0 = arith.cmpi eq, %arg1, %c0_i32 : i32
    %1 = arith.extui %0 : i1 to i32
    %c0_i32_0 = arith.constant 0 : i32
    %2 = arith.cmpi ne, %1, %c0_i32_0 : i32
    scf.if %2 {
      %cst_10 = arith.constant 0.000000e+00 : f32
      %13 = vector.broadcast %cst_10 : f32 to vector<128x128xf32>
      %c0_11 = arith.constant 0 : index
      %c0_12 = arith.constant 0 : index
      %14 = vector.load %arg7[%c0_11, %c0_12] : memref<128x128xf32, #tpu.memory_space<vmem>>, vector<128x128xf32>
      tpu.vector_store %arg7[%c0_11, %c0_12], %13 {strides = array<i32>} : memref<128x128xf32, #tpu.memory_space<vmem>>, vector<128x128xf32>,
    } else {
    }
    %c0 = arith.constant 0 : index
    %c0_1 = arith.constant 0 : index
    %3 = vector.load %arg7[%c0, %c0_1] : memref<128x128xf32, #tpu.memory_space<vmem>>, vector<128x128xf32>
    %c0_2 = arith.constant 0 : index
    %c0_3 = arith.constant 0 : index
    %4 = vector.load %arg2[%c0_2, %c0_3] : memref<128x128xbf16, #tpu.memory_space<vmem>>, vector<128x128xbf16>
    %c0_4 = arith.constant 0 : index
    %c0_5 = arith.constant 0 : index
    %5 = vector.load %arg3[%c0_4, %c0_5] : memref<128x128xf32, #tpu.memory_space<vmem>>, vector<128x128xf32>
    %6 = arith.truncf %5 : vector<128x128xf32> to vector<128x128xbf16>
    %cst = arith.constant dense<0.000000e+00> : vector<128x128xf32>
    %7 = tpu.matmul %4, %6, %cst {dimension_numbers = #tpu.dot_dimension_numbers<[1], [0], [0], [1], [0, 0, 1, 1], [], []>} : vector<128x128xbf16>, vector<128x128xbf16>, vector<128x128xf32> -> vector<128x128xf32>
    %8 = arith.addf %3, %7 : vector<128x128xf32>
    %c0_6 = arith.constant 0 : index
    %c0_7 = arith.constant 0 : index
    %9 = vector.load %arg7[%c0_6, %c0_7] : memref<128x128xf32, #tpu.memory_space<vmem>>, vector<128x128xf32>
    tpu.vector_store %arg7[%c0_6, %c0_7], %8 {strides = array<i32>} : memref<128x128xf32, #tpu.memory_space<vmem>>, vector<128x128xf32>,
    %c0_i32_8 = arith.constant 0 : i32
    %10 = arith.cmpi eq, %arg1, %c0_i32_8 : i32
    %11 = arith.extui %10 : i1 to i32
    %c0_i32_9 = arith.constant 0 : i32
    %12 = arith.cmpi ne, %11, %c0_i32_9 : i32
    scf.if %12 {
      %c0_10 = arith.constant 0 : index
      %c0_11 = arith.constant 0 : index
      %13 = vector.load %arg7[%c0_10, %c0_11] : memref<128x128xf32, #tpu.memory_space<vmem>>, vector<128x128xf32>
      %c0_12 = arith.constant 0 : index
      %c0_13 = arith.constant 0 : index
      %14 = vector.load %arg4[%c0_12, %c0_13] : memref<128x128xf32, #tpu.memory_space<vmem>>, vector<128x128xf32>
      %cst_14 = arith.constant dense<0.000000e+00> : vector<128x128xf32>
      %15 = tpu.matmul %13, %14, %cst_14 {dimension_numbers = #tpu.dot_dimension_numbers<[1], [0], [0], [1], [0, 0, 1, 1], [], []>} : vector<128x128xf32>, vector<128x128xf32>, vector<128x128xf32> -> vector<128x128xf32>
      %c0_15 = arith.constant 0 : index
      %c0_16 = arith.constant 0 : index
      %16 = vector.load %arg5[%c0_15, %c0_16] : memref<1x128xf32, #tpu.memory_space<vmem>>, vector<1x128xf32>
      %17 = vector.broadcast %16 : vector<1x128xf32> to vector<128x128xf32>
      %18 = arith.addf %15, %17 : vector<128x128xf32>
      %cst_17 = arith.constant 0.000000e+00 : f32
      %19 = vector.broadcast %cst_17 : f32 to vector<128x128xf32>
      %20 = arith.maximumf %18, %19 : vector<128x128xf32>
      %c0_18 = arith.constant 0 : index
      %c0_19 = arith.constant 0 : index
      %21 = vector.load %arg6[%c0_18, %c0_19] : memref<128x128xf32, #tpu.memory_space<vmem>>, vector<128x128xf32>
      tpu.vector_store %arg6[%c0_18, %c0_19], %20 {strides = array<i32>} : memref<128x128xf32, #tpu.memory_space<vmem>>, vector<128x128xf32>,
    } else {
    }
    return
  }
  func.func @transform_0(%arg0: i32, %arg1: i32) -> (i32, i32) {
    %c0_i32 = arith.constant 0 : i32
    return %arg0, %arg1 : i32, i32
  }
  func.func @transform_1(%arg0: i32, %arg1: i32) -> (i32, i32) {
    %c0_i32 = arith.constant 0 : i32
    %c0_i32_0 = arith.constant 0 : i32
    return %arg1, %c0_i32 : i32, i32
  }
  func.func @transform_2(%arg0: i32, %arg1: i32) -> (i32, i32) {
    %c0_i32 = arith.constant 0 : i32
    %c0_i32_0 = arith.constant 0 : i32
    %c0_i32_1 = arith.constant 0 : i32
    return %c0_i32, %c0_i32_0 : i32, i32
  }
  func.func @transform_3(%arg0: i32, %arg1: i32) -> (i32, i32) {
    %c0_i32 = arith.constant 0 : i32
    %c0_i32_0 = arith.constant 0 : i32
    %c0_i32_1 = arith.constant 0 : i32
    return %c0_i32, %c0_i32_0 : i32, i32
  }
  func.func @transform_4(%arg0: i32, %arg1: i32) -> (i32, i32) {
    %c0_i32 = arith.constant 0 : i32
    %c0_i32_0 = arith.constant 0 : i32
    return %arg0, %c0_i32 : i32, i32
  }
}

</mosaic_0001>

<bundles_post_ra>
// kernel: tpu_custom_call.1
= control target key start
LH: loop header
LB: loop body
LE: loop exit
PB: predicated region body
PF: predicated region fallthrough
CT: control target
= control target key end

     0   :  { %9 = vsyncpa [#allocation4], 0  ;;  %s872_s0 = inlined_call_operand.hbm [shape: bf16[128,128], index: 0, kind: input, shape index: {}]   ;;  %s873_s1 = inlined_call_operand.hbm [shape: f32[128,128], index: 1, kind: input, shape index: {}]   ;;  %s874_s2 = inlined_call_operand.hbm [shape: f32[128,128], index: 2, kind: input, shape index: {}]   ;;  %s875_s3 = inlined_call_operand.vmem [shape: f32[1,128], index: 3, kind: input, shape index: {}]   ;;  %s876_s4 = inlined_call_operand.hbm [shape: f32[128,128], index: 4, kind: output, shape index: {}]  }
   0x1   :  { %10 = vsyncpa [#allocation7], 0 }
   0x2   :  { %11 = vsyncpa [#allocation5], 0  ;;  %s797_s15 = smov [#allocation6]  }
   0x3   :  { %s29_s16 = sshll.u32 %s797_s15, 4  ;;  %s30_s16 = int_to_ptr.vmem [resolvable:$true] %s29_s16 }
   0x4   :  { %s719_s17 = scalar_lea.vmem %s30_s16, 2048  ;;  %p724_p1 = scmp.lt.s32.totalorder %s30_s16, %s30_s16 }
   0x5   :  { %p720_p0 = scmp.ne.s32.totalorder %s30_s16, %s719_s17  ;;  %p725_p2 = scmp.lt.s32.totalorder %s719_s17, %s719_s17 }
   0x7   :  { %p726_p3 = por %p725_p2, %p724_p1 }
   0x9   :  { %p727_p4 = pnand %p726_p3, %p720_p0 }
   0xb   :  { %730 = shalt.err (!%p727_p4)
}
   0xc   :  { %s798_s18 = smov 128   ;;  %s799_s19 = smov 8  }
   0xd   :  { %35 = dma.hbm_to_vmem [thread:$0]  %s873_s1, 2048, %s30_s16, [#allocation7], %s798_s18, %s798_s18, %s799_s19  }
   0xe   :  { %s800_s22 = smov [#allocation3]  }
   0xf   :  { %s17_s23 = sshll.u32 %s800_s22, 4  ;;  %s18_s23 = int_to_ptr.vmem [resolvable:$true] %s17_s23 }
  0x10   :  { %s739_s24 = scalar_lea.vmem %s18_s23, 1024  ;;  %p744_p6 = scmp.lt.s32.totalorder %s18_s23, %s18_s23 }
  0x11   :  { %p740_p5 = scmp.ne.s32.totalorder %s18_s23, %s739_s24  ;;  %p745_p7 = scmp.lt.s32.totalorder %s739_s24, %s739_s24 }
  0x13   :  { %p746_p8 = por %p745_p7, %p744_p6 }
  0x15   :  { %p747_p9 = pnand %p746_p8, %p740_p5 }
  0x17   :  { %750 = shalt.err (!%p747_p9)
}
  0x18   :  { %s801_s25 = smov 64   ;;  %s802_s26 = smov 4  }
  0x19   :  { %23 = dma.hbm_to_vmem [thread:$0]  %s872_s0, 1024, %s18_s23, [#allocation4], %s801_s25, %s801_s25, %s802_s26  }
  0x1a   :  { %s803_s29 = smov [#allocation8]  }
  0x1b   :  { %s41_s30 = sshll.u32 %s803_s29, 4  ;;  %s42_s30 = int_to_ptr.vmem [resolvable:$true] %s41_s30 }
  0x1c   :  { %s759_s1 = scalar_lea.vmem %s42_s30, 2048  ;;  %p764_p11 = scmp.lt.s32.totalorder %s42_s30, %s42_s30 }
  0x1d   :  { %p760_p10 = scmp.ne.s32.totalorder %s42_s30, %s759_s1  ;;  %p765_p12 = scmp.lt.s32.totalorder %s759_s1, %s759_s1 }
  0x1f   :  { %p766_p13 = por %p765_p12, %p764_p11 }
  0x21   :  { %p767_p0 = pnand %p766_p13, %p760_p10 }
  0x23   :  { %770 = shalt.err (!%p767_p0)
}
  0x24   :  { %47 = dma.hbm_to_vmem [thread:$0]  %s874_s2, 2048, %s42_s30, [#allocation7], %s798_s18, %s798_s18, %s799_s19  }
  0x25   :  { %791 = dma.done.wait [#allocation4], 1024  }
  0x26   :  { %792 = vsyncadd [#allocation4], 4294966272 }
  0x27   :  { %793 = dma.done.wait [#allocation7], 4096  }
  0x28   :  { %794 = vsyncadd [#allocation7], 4294963200  ;;  %v126_v0 = vld [vmem:[#allocation6 + $0x70] sm:$0xff]  ;;  %v127_v1 = vld [vmem:[#allocation6 + $0x78] sm:$0xff] }
  0x29   :  { %v124_v2 = vld [vmem:[#allocation6 + $0x60] sm:$0xff]  ;;  %v135_v3 = vpack.c.bf16 %v127_v1, %v126_v0  ;;  %v125_v4 = vld [vmem:[#allocation6 + $0x68] sm:$0xff]  ;;  %v122_v6 = vld [vmem:[#allocation6 + $0x50] sm:$0xff] }
  0x2a   :  { %v134_v5 = vpack.c.bf16 %v125_v4, %v124_v2  ;;  %v123_v7 = vld [vmem:[#allocation6 + $0x58] sm:$0xff]  ;;  %v120_v8 = vld [vmem:[#allocation6 + $0x40] sm:$0xff]  ;;  %v121_v10 = vld [vmem:[#allocation6 + $0x48] sm:$0xff] }
  0x2b   :  { %607 = vmatprep.subr.bf16.mxu0 %v135_v3  ;;  %v133_v9 = vpack.c.bf16 %v123_v7, %v122_v6  ;;  %v703_v11 = vld [vmem:[#allocation3] sm:$0xff]   ;;  %v132_v12 = vpack.c.bf16 %v121_v10, %v120_v8  ;;  %v118_v13 = vld [vmem:[#allocation6 + $0x30] sm:$0xff]  ;;  %v119_v14 = vld [vmem:[#allocation6 + $0x38] sm:$0xff] }
  0x2c   :  { %608 = vmatpush3.bf16.msra.mxu0 %v135_v3  ;;  %623 = vmatprep.mubr.bf16.mxu0 %v703_v11  ;;  %v131_v15 = vpack.c.bf16 %v119_v14, %v118_v13  ;;  %v347_v16 = vld [vmem:[#allocation8 + $0x78] sm:$0xff]  ;;  %v346_v17 = vld [vmem:[#allocation8 + $0x70] sm:$0xff]  ;;  %v116_v18 = vld [vmem:[#allocation6 + $0x20] sm:$0xff] }
  0x2d   :  { %609 = vmatprep.subr.bf16.mxu0 %v134_v5  ;;  %v117_v19 = vld [vmem:[#allocation6 + $0x28] sm:$0xff]  ;;  %639 = vmatprep.subr.mxu1 %v347_v16  ;;  %v344_v22 = vld [vmem:[#allocation8 + $0x60] sm:$0xff]  ;;  %v114_v23 = vld [vmem:[#allocation6 + $0x10] sm:$0xff] }
  0x2e   :  { %640 = vmatpush3.msra.mxu1 %v347_v16  ;;  %v345_v20 = vld [vmem:[#allocation8 + $0x68] sm:$0xff]  ;;  %v130_v21 = vpack.c.bf16 %v117_v19, %v116_v18  ;;  %v115_v24 = vld [vmem:[#allocation6 + $0x18] sm:$0xff]  ;;  %v342_v27 = vld [vmem:[#allocation8 + $0x50] sm:$0xff] }
  0x2f   :  { %641 = vmatprep.subr.mxu1 %v346_v17  ;;  %v343_v25 = vld [vmem:[#allocation8 + $0x58] sm:$0xff]  ;;  %v129_v26 = vpack.c.bf16 %v115_v24, %v114_v23  ;;  %v112_v28 = vld [vmem:[#allocation6] sm:$0xff]  ;;  %v113_v29 = vld [vmem:[#allocation6 + $0x8] sm:$0xff] }
  0x30   :  { %610 = vmatpush3.bf16.msra.mxu0 %v134_v5  ;;  %642 = vmatpush3.msra.mxu1 %v346_v17  ;;  %v341_v30 = vld [vmem:[#allocation8 + $0x48] sm:$0xff]  ;;  %v128_v31 = vpack.c.bf16 %v113_v29, %v112_v28  ;;  %v340_v32 = vld [vmem:[#allocation8 + $0x40] sm:$0xff]  ;;  %v339_v33 = vld [vmem:[#allocation8 + $0x38] sm:$0xff] }
  0x31   :  { %611 = vmatprep.subr.bf16.mxu0 %v133_v9  ;;  %643 = vmatprep.subr.mxu1 %v345_v20  ;;  %v338_v34 = vld [vmem:[#allocation8 + $0x30] sm:$0xff]  ;;  %v704_v35 = vld [vmem:[#allocation3 + $0x8] sm:$0xff]   ;;  %v336_v38 = vld [vmem:[#allocation8 + $0x20] sm:$0xff] }
  0x32   :  { %644 = vmatpush3.msra.mxu1 %v345_v20  ;;  %v337_v36 = vld [vmem:[#allocation8 + $0x28] sm:$0xff]  ;;  %v705_v37 = vld [vmem:[#allocation3 + $0x10] sm:$0xff]   ;;  %v335_v39 = vld [vmem:[#allocation8 + $0x18] sm:$0xff] }
  0x33   :  { %645 = vmatprep.subr.mxu1 %v344_v22  ;;  %v706_v40 = vld [vmem:[#allocation3 + $0x18] sm:$0xff]   ;;  %v707_v41 = vld [vmem:[#allocation3 + $0x20] sm:$0xff]   ;;  %v708_v42 = vld [vmem:[#allocation3 + $0x28] sm:$0xff]  }
  0x34   :  { %612 = vmatpush3.bf16.msra.mxu0 %v133_v9  ;;  %646 = vmatpush3.msra.mxu1 %v344_v22  ;;  %v709_v43 = vld [vmem:[#allocation3 + $0x30] sm:$0xff]   ;;  %v710_v44 = vld [vmem:[#allocation3 + $0x38] sm:$0xff]   ;;  %v333_v46 = vld [vmem:[#allocation8 + $0x8] sm:$0xff] }
  0x35   :  { %613 = vmatprep.subr.bf16.mxu0 %v132_v12  ;;  %647 = vmatprep.subr.mxu1 %v343_v25  ;;  %v334_v45 = vld [vmem:[#allocation8 + $0x10] sm:$0xff]  ;;  %v332_v47 = vld [vmem:[#allocation8] sm:$0xff] }
  0x36   :  { %648 = vmatpush3.msra.mxu1 %v343_v25  ;;  %v848_v0 = vld [vmem:[%s875_s3] ss:$0 sm:$0xff]  ;;  %s804_s3 = smov [#allocation9]  }
  0x37   :  { %649 = vmatprep.subr.mxu1 %v342_v27  ;;  %s537_s7 = sshll.u32 %s804_s3, 4  ;;  %s538_s7 = int_to_ptr.vmem [resolvable:$true] %s537_s7 }
  0x38   :  { %614 = vmatpush3.bf16.msra.mxu0 %v132_v12  ;;  %650 = vmatpush3.msra.mxu1 %v342_v27  ;;  %s771_s8 = scalar_lea.vmem %s538_s7, 2048  ;;  %p776_p2 = scmp.lt.s32.totalorder %s538_s7, %s538_s7 }
  0x39   :  { %615 = vmatprep.subr.bf16.mxu0 %v131_v15  ;;  %651 = vmatprep.subr.mxu1 %v341_v30  ;;  %p772_p1 = scmp.ne.s32.totalorder %s538_s7, %s771_s8  ;;  %p777_p3 = scmp.lt.s32.totalorder %s771_s8, %s771_s8 }
  0x3a   :  { %652 = vmatpush3.msra.mxu1 %v341_v30 }
  0x3b   :  { %653 = vmatprep.subr.mxu1 %v340_v32  ;;  %p778_p4 = por %p777_p3, %p776_p2 }
  0x3c   :  { %616 = vmatpush3.bf16.msra.mxu0 %v131_v15  ;;  %654 = vmatpush3.msra.mxu1 %v340_v32 }
  0x3d   :  { %617 = vmatprep.subr.bf16.mxu0 %v130_v21  ;;  %655 = vmatprep.subr.mxu1 %v339_v33  ;;  %p779_p5 = pnand %p778_p4, %p772_p1 }
  0x3e   :  { %656 = vmatpush3.msra.mxu1 %v339_v33 }
  0x3f   :  { %657 = vmatprep.subr.mxu1 %v338_v34 }
  0x40   :  { %618 = vmatpush3.bf16.msra.mxu0 %v130_v21  ;;  %658 = vmatpush3.msra.mxu1 %v338_v34 }
  0x41   :  { %619 = vmatprep.subr.bf16.mxu0 %v129_v26  ;;  %659 = vmatprep.subr.mxu1 %v337_v36 }
  0x42   :  { %660 = vmatpush3.msra.mxu1 %v337_v36 }
  0x43   :  { %661 = vmatprep.subr.mxu1 %v336_v38 }
  0x44   :  { %620 = vmatpush3.bf16.msra.mxu0 %v129_v26  ;;  %662 = vmatpush3.msra.mxu1 %v336_v38 }
  0x45   :  { %621 = vmatprep.subr.bf16.mxu0 %v128_v31  ;;  %663 = vmatprep.subr.mxu1 %v335_v39 }
  0x46   :  { %664 = vmatpush3.msra.mxu1 %v335_v39 }
  0x47   :  { %665 = vmatprep.subr.mxu1 %v334_v45 }
  0x48   :  { %622 = vmatpush3.bf16.msra.mxu0 %v128_v31  ;;  %666 = vmatpush3.msra.mxu1 %v334_v45 }
  0x49   :  { %667 = vmatprep.subr.mxu1 %v333_v46 }
  0x4a   :  { %668 = vmatpush3.msra.mxu1 %v333_v46 }
  0x4b   :  { %624 = vmatmul.mubr.bf16.vlgmr.msra.gmra.mxu0 %v704_v35  ;;  %669 = vmatprep.subr.mxu1 %v332_v47 }
  0x4c   :  { %627 = vmatprep.mubr.bf16.mxu0 %v705_v37  ;;  %670 = vmatpush3.msra.mxu1 %v332_v47 }
  0x53   :  { %628 = vmatmul.mubr.bf16.gmra.mxu0 %v706_v40 }
  0x54   :  { %631 = vmatprep.mubr.bf16.mxu0 %v707_v41 }
  0x5b   :  { %632 = vmatmul.mubr.bf16.gmra.mxu0 %v708_v42 }
  0x5c   :  { %635 = vmatprep.mubr.bf16.mxu0 %v709_v43 }
  0x63   :  { %636 = vmatmul.mubr.bf16.gmra.mxu0 %v710_v44 }
 0x10b   :  { %v625_v48 = vpop.f32.mrf.mxu0 }
 0x10d   :  { %v218_v49 = vpop.f32.mrf.mxu0 }
 0x10e   :  { %671 = vmatprep.mubr.f32.mxu1 %v218_v49 }
 0x10f   :  { %v626_v50 = vpop.f32.mrf.mxu0 }
 0x111   :  { %v221_v51 = vpop.f32.mrf.mxu0 }
 0x112   :  { %672 = vmatmul.mubr.f32.vlgmr.msra.gmra.mxu1 %v221_v51 }
 0x113   :  { %v629_v52 = vpop.f32.mrf.mxu0  ;;  %674 = vmatprep.mubr.f32.mxu1 %v625_v48 }
 0x115   :  { %v234_v53 = vpop.f32.mrf.mxu0 }
 0x116   :  { %675 = vmatmul.mubr.f32.gmra.mxu1 %v626_v50 }
 0x117   :  { %v630_v54 = vpop.f32.mrf.mxu0  ;;  %677 = vmatprep.mubr.f32.mxu1 %v234_v53 }
 0x119   :  { %v237_v55 = vpop.f32.mrf.mxu0 }
 0x11a   :  { %678 = vmatmul.mubr.f32.gmra.mxu1 %v237_v55 }
 0x11b   :  { %v633_v56 = vpop.f32.mrf.mxu0  ;;  %680 = vmatprep.mubr.f32.mxu1 %v629_v52 }
 0x11d   :  { %v250_v57 = vpop.f32.mrf.mxu0 }
 0x11e   :  { %681 = vmatmul.mubr.f32.gmra.mxu1 %v630_v54 }
 0x11f   :  { %v634_v58 = vpop.f32.mrf.mxu0  ;;  %683 = vmatprep.mubr.f32.mxu1 %v250_v57 }
 0x121   :  { %v253_v59 = vpop.f32.mrf.mxu0 }
 0x122   :  { %684 = vmatmul.mubr.f32.gmra.mxu1 %v253_v59 }
 0x123   :  { %v637_v60 = vpop.f32.mrf.mxu0  ;;  %686 = vmatprep.mubr.f32.mxu1 %v633_v56 }
 0x125   :  { %v266_v61 = vpop.f32.mrf.mxu0 }
 0x126   :  { %687 = vmatmul.mubr.f32.gmra.mxu1 %v634_v58 }
 0x127   :  { %v638_v62 = vpop.f32.mrf.mxu0  ;;  %689 = vmatprep.mubr.f32.mxu1 %v266_v61 }
 0x129   :  { %v269_v63 = vpop.f32.mrf.mxu0 }
 0x12a   :  { %690 = vmatmul.mubr.f32.gmra.mxu1 %v269_v63 }
 0x12b   :  { %692 = vmatprep.mubr.f32.mxu1 %v637_v60 }
 0x12e   :  { %693 = vmatmul.mubr.f32.gmra.mxu1 %v638_v62 }
 0x1d2   :  { %v673_v1 = vpop.f32.mrf.mxu1 }
 0x1d3   :  { %v427_v2 = vadd.f32 %v673_v1, %v848_v0 }
 0x1d4   :  { %v421_v3 = vpop.f32.mrf.mxu1 }
 0x1d5   :  { %v501_v4 = vmax.f32 %v427_v2, 0.0  ;;  %v422_v5 = vadd.f32 %v848_v0, %v421_v3 }
 0x1d6   :  { %v676_v6 = vpop.f32.mrf.mxu1 }
 0x1d7   :  { %517 = vst [vmem:[#allocation9 + $0x8] sm:$0xff] %v501_v4  ;;  %v500_v7 = vmax.f32 %v422_v5, 0.0  ;;  %v437_v8 = vadd.f32 %v676_v6, %v848_v0 }
 0x1d8   :  { %v431_v9 = vpop.f32.mrf.mxu1 }
 0x1d9   :  { %516 = vst [vmem:[#allocation9] sm:$0xff] %v500_v7  ;;  %v503_v10 = vmax.f32 %v437_v8, 0.0  ;;  %v432_v11 = vadd.f32 %v848_v0, %v431_v9 }
 0x1da   :  { %v679_v12 = vpop.f32.mrf.mxu1 }
 0x1db   :  { %519 = vst [vmem:[#allocation9 + $0x18] sm:$0xff] %v503_v10  ;;  %v502_v13 = vmax.f32 %v432_v11, 0.0  ;;  %v447_v14 = vadd.f32 %v679_v12, %v848_v0 }
 0x1dc   :  { %v441_v15 = vpop.f32.mrf.mxu1 }
 0x1dd   :  { %518 = vst [vmem:[#allocation9 + $0x10] sm:$0xff] %v502_v13  ;;  %v505_v16 = vmax.f32 %v447_v14, 0.0  ;;  %v442_v17 = vadd.f32 %v848_v0, %v441_v15 }
 0x1de   :  { %v682_v18 = vpop.f32.mrf.mxu1 }
 0x1df   :  { %521 = vst [vmem:[#allocation9 + $0x28] sm:$0xff] %v505_v16  ;;  %v504_v19 = vmax.f32 %v442_v17, 0.0  ;;  %v457_v20 = vadd.f32 %v682_v18, %v848_v0 }
 0x1e0   :  { %v451_v21 = vpop.f32.mrf.mxu1 }
 0x1e1   :  { %520 = vst [vmem:[#allocation9 + $0x20] sm:$0xff] %v504_v19  ;;  %v507_v22 = vmax.f32 %v457_v20, 0.0  ;;  %v452_v23 = vadd.f32 %v848_v0, %v451_v21 }
 0x1e2   :  { %v685_v24 = vpop.f32.mrf.mxu1 }
 0x1e3   :  { %523 = vst [vmem:[#allocation9 + $0x38] sm:$0xff] %v507_v22  ;;  %v506_v25 = vmax.f32 %v452_v23, 0.0  ;;  %v467_v26 = vadd.f32 %v685_v24, %v848_v0 }
 0x1e4   :  { %v461_v27 = vpop.f32.mrf.mxu1 }
 0x1e5   :  { %522 = vst [vmem:[#allocation9 + $0x30] sm:$0xff] %v506_v25  ;;  %v509_v28 = vmax.f32 %v467_v26, 0.0  ;;  %v462_v29 = vadd.f32 %v848_v0, %v461_v27 }
 0x1e6   :  { %v688_v30 = vpop.f32.mrf.mxu1 }
 0x1e7   :  { %525 = vst [vmem:[#allocation9 + $0x48] sm:$0xff] %v509_v28  ;;  %v508_v31 = vmax.f32 %v462_v29, 0.0  ;;  %v477_v32 = vadd.f32 %v688_v30, %v848_v0 }
 0x1e8   :  { %v471_v33 = vpop.f32.mrf.mxu1 }
 0x1e9   :  { %524 = vst [vmem:[#allocation9 + $0x40] sm:$0xff] %v508_v31  ;;  %v511_v34 = vmax.f32 %v477_v32, 0.0  ;;  %v472_v35 = vadd.f32 %v848_v0, %v471_v33 }
 0x1ea   :  { %v691_v36 = vpop.f32.mrf.mxu1 }
 0x1eb   :  { %527 = vst [vmem:[#allocation9 + $0x58] sm:$0xff] %v511_v34  ;;  %v510_v37 = vmax.f32 %v472_v35, 0.0  ;;  %v487_v38 = vadd.f32 %v691_v36, %v848_v0 }
 0x1ec   :  { %v481_v39 = vpop.f32.mrf.mxu1 }
 0x1ed   :  { %526 = vst [vmem:[#allocation9 + $0x50] sm:$0xff] %v510_v37  ;;  %v513_v40 = vmax.f32 %v487_v38, 0.0  ;;  %v482_v41 = vadd.f32 %v848_v0, %v481_v39 }
 0x1ee   :  { %v694_v42 = vpop.f32.mrf.mxu1 }
 0x1ef   :  { %529 = vst [vmem:[#allocation9 + $0x68] sm:$0xff] %v513_v40  ;;  %v512_v43 = vmax.f32 %v482_v41, 0.0  ;;  %v497_v44 = vadd.f32 %v694_v42, %v848_v0 }
 0x1f0   :  { %v491_v45 = vpop.f32.mrf.mxu1 }
 0x1f1   :  { %528 = vst [vmem:[#allocation9 + $0x60] sm:$0xff] %v512_v43  ;;  %v515_v46 = vmax.f32 %v497_v44, 0.0  ;;  %v492_v47 = vadd.f32 %v848_v0, %v491_v45 }
 0x1f3   :  { %531 = vst [vmem:[#allocation9 + $0x78] sm:$0xff] %v515_v46  ;;  %v514_v48 = vmax.f32 %v492_v47, 0.0 }
 0x1f5   :  { %530 = vst [vmem:[#allocation9 + $0x70] sm:$0xff] %v514_v48 }
 0x1f6   :  { %782 = shalt.err (!%p779_p5)
}
 0x1f7   :  { %543 = dma.vmem_to_hbm [thread:$0]  %s538_s7, 2048, %s876_s4, [#allocation5], %s798_s18, %s798_s18, %s799_s19  }
 0x1f8   :  { %795 = dma.done.wait [#allocation5], 2048  }
 0x1f9   :  { %796 = vsyncadd [#allocation5], 4294965248 }
 0x1fa   :  { %547 = vsyncpa [#allocation4], 1 }
 0x1fb   :  { %548 = vsyncpa [#allocation7], 1 }
 0x1fc   :  { %549 = vsyncpa [#allocation5], 1 }

</bundles_post_ra>
